<compile_context>
chip_gen: v7x
topology: tpu7x:2x2x1
jax: 0.10.0
libtpu: 0.0.40
codegen_flags: <defaults>
</compile_context>

<pallas_src>
import functools

import jax
import jax.numpy as jnp
from jax import lax
from jax.experimental import pallas as pl
from jax.experimental.pallas import tpu as pltpu


def _round_up(n, m):
    return (n + m - 1) // m * m


def _vmem_capacity_bytes():
    """Physical per-core VMEM (128 MiB on v5e/v6e, 64 MiB on v7x); safe fallback."""
    try:
        info = pltpu.get_tpu_info()
        cap = int(getattr(info, "vmem_capacity_bytes", 0))
        if cap > 0:
            return cap
    except Exception:
        pass
    return 64 << 20


def _mlp_gate(s, w1_ref, b1_ref, w2_ref, b2_ref):
    """s: (C_pad, 2) f32, columns = [mean-squeeze, max-squeeze].

    gate = sigmoid(W2 relu(W1 mean + b1) + b2 + W2 relu(W1 max + b1) + b2), computed as
    a single fused 2-column matmul chain (one MXU push per layer instead of two)."""
    h = jnp.dot(w1_ref[...], s, preferred_element_type=jnp.float32) + b1_ref[...]
    h = jnp.maximum(h, 0.0)                                                   # ReLU
    h2 = jnp.dot(w2_ref[...], h, preferred_element_type=jnp.float32) + b2_ref[...]
    return jax.nn.sigmoid(jnp.sum(h2, axis=-1, keepdims=True))                # col0+col1


def _gate_from_squeeze(mean, mx, C, w1_ref, b1_ref, w2_ref, b2_ref, s_sc):
    """mean/mx: (C, 1) f32.  Pads the squeeze to the MLP's sublane-aligned C_pad rows
    via a tiny VMEM scratch (no whole-tensor padding) and returns the (C, 1) gate."""
    lane = lax.broadcasted_iota(jnp.int32, (C, 2), 1)
    s = jnp.where(lane == 0, mean, mx)                                        # (C, 2)
    if s_sc.shape[0] == C:
        s_sc[...] = s
    else:
        s_sc[...] = jnp.zeros_like(s_sc)       # padded rows hit zero weight columns
        s_sc[0:C, :] = s
    return _mlp_gate(s_sc[...], w1_ref, b1_ref, w2_ref, b2_ref)[0:C, :]


def _fused_kernel(C, inv_hw, x_ref, w1_ref, b1_ref, w2_ref, b2_ref, o_ref, s_sc):
    """Single pass: whole unpadded (C, HW) slab resident in VMEM for one batch item."""
    x = x_ref[...]                                                            # (C, HW)
    # Exact f32 spatial sum/max on VPU+XLU (no MXU bf16 rounding, no mask needed).
    mean = jnp.sum(x, axis=-1, keepdims=True, dtype=jnp.float32) * inv_hw
    mx = jnp.max(x, axis=-1, keepdims=True).astype(jnp.float32)
    gate = _gate_from_squeeze(mean, mx, C, w1_ref, b1_ref, w2_ref, b2_ref, s_sc)
    # Apply in the input dtype -> no full-slab f32 temporary in the epilogue.
    o_ref[...] = x * gate.astype(x.dtype)


def _reduce_kernel(C, true_hw, tile_hw, needs_mask,
                   x_ref, w1_ref, b1_ref, w2_ref, b2_ref, gate_ref,
                   sum_sc, max_sc, s_sc):
    """Tiled pass 1: running sum/max over HW tiles; gate written at the last tile."""
    t = pl.program_id(1)
    last = pl.num_programs(1) - 1

    @pl.when(t == 0)
    def _init():
        sum_sc[...] = jnp.zeros_like(sum_sc)
        max_sc[...] = jnp.full_like(max_sc, -jnp.inf)

    x = x_ref[...]                                                            # (C, THW)
    # Padded tail columns are zero -> the exact f32 sum needs no mask.
    sum_sc[...] += jnp.sum(x, axis=-1, keepdims=True, dtype=jnp.float32)

    def _accum_max(xt):
        max_sc[...] = jnp.maximum(
            max_sc[...], jnp.max(xt, axis=-1, keepdims=True).astype(jnp.float32))

    if needs_mask:
        # Only the LAST tile contains padded columns -> mask only there.
        @pl.when(t == last)
        def _masked():
            col = lax.broadcasted_iota(jnp.int32, x.shape, 1) + t * tile_hw
            _accum_max(jnp.where(col < true_hw, x, jnp.full_like(x, -jnp.inf)))

        @pl.when(t != last)
        def _plain():
            _accum_max(x)
    else:
        _accum_max(x)

    @pl.when(t == last)
    def _finish():
        mean = sum_sc[...] * (1.0 / true_hw)
        gate_ref[...] = _gate_from_squeeze(mean, max_sc[...], C,
                                           w1_ref, b1_ref, w2_ref, b2_ref, s_sc)


def _apply_kernel(x_ref, gate_ref, o_ref):
    """Tiled pass 2: elementwise apply of the per-channel gate, in x.dtype."""
    o_ref[...] = x_ref[...] * gate_ref[...].astype(o_ref.dtype)


def channel_mean_max_soft_attention(x, w1, b1, w2, b2, *,
                                    hw_tile=None, force_tiled=False):
    """x: (B, C, H, W).  w1: (C//2, C), b1: (C//2,), w2: (C, C//2), b2: (C,).

    Output dtype == x.dtype (bf16 I/O supported; reduction/MLP/sigmoid math is f32)."""
    B, C, H, W = x.shape
    HW = H * W
    Cr = w1.shape[0]
    dt = x.dtype
    itemsize = x.dtype.itemsize
    f32 = jnp.float32

    # MLP-side sublane padding only (x itself is never padded or copied in HBM for the
    # fused path).
    C_pad = _round_up(C, 8)
    Cr_pad = _round_up(Cr, 8)

    # ---- generation-aware VMEM budgets ---------------------------------------------
    vmem_cap = _vmem_capacity_bytes()
    vmem_ceiling = max(vmem_cap - (12 << 20), 24 << 20)        # headroom below physical
    fused_budget = min(vmem_ceiling, 100 << 20)                # ~100 MiB v6e/v5e, ~52 v7x

    # Physical VMEM footprint of one (C, HW) slab: sublane multiple is dtype-dependent
    # (8 for f32, 16 for bf16, 32 for int8), lanes rounded to 128.
    sub_mult = max(8, 32 // max(itemsize, 1))
    c_phys = _round_up(C, sub_mult)
    hw_phys = _round_up(HW, 128)
    slab_phys = c_phys * hw_phys * itemsize
    weight_bytes = 4 * (Cr_pad * C_pad + Cr_pad + C_pad * Cr_pad + C_pad)

    # in + out double-buffered (4 slabs) + 1 slab of epilogue slack; sub-32-bit inputs
    # also account for the f32 temporary created by the f32-accumulating row sum.
    fused_need = 5 * slab_phys + 2 * weight_bytes + (2 << 20)
    if itemsize < 4:
        fused_need += c_phys * hw_phys * 4
    use_fused = (not force_tiled) and (fused_need <= fused_budget)

    x_flat = x.reshape(B, C, HW)                               # metadata-only reshape

    w1p = jnp.zeros((Cr_pad, C_pad), f32).at[:Cr, :C].set(w1.astype(f32))
    b1p = jnp.zeros((Cr_pad, 1), f32).at[:Cr, 0].set(b1.astype(f32))
    w2p = jnp.zeros((C_pad, Cr_pad), f32).at[:C, :Cr].set(w2.astype(f32))
    b2p = jnp.zeros((C_pad, 1), f32).at[:C, 0].set(b2.astype(f32))
    weights = (w1p, b1p, w2p, b2p)
    weight_specs = [pl.BlockSpec(w.shape, lambda *idx: (0, 0)) for w in weights]

    if use_fused:
        vmem_limit = int(min(max(fused_need, 32 << 20), vmem_ceiling))
        out_flat = pl.pallas_call(
            functools.partial(_fused_kernel, C, 1.0 / HW),
            out_shape=jax.ShapeDtypeStruct((B, C, HW), dt),
            grid_spec=pltpu.PrefetchScalarGridSpec(
                num_scalar_prefetch=0,
                grid=(B,),                       # B >= 2 keeps both v7x TensorCores busy
                in_specs=[pl.BlockSpec((pl.Squeezed(), C, HW),
                                       lambda b: (b, 0, 0))] + weight_specs,
                out_specs=pl.BlockSpec((pl.Squeezed(), C, HW), lambda b: (b, 0, 0)),
                scratch_shapes=[pltpu.VMEM((C_pad, 2), f32)],
            ),
            compiler_params=pltpu.CompilerParams(
                dimension_semantics=("parallel",),
                vmem_limit_bytes=vmem_limit),
            # no input_output_aliases: x_flat is a view of the (non-donated) caller input;
            # aliasing it would force a defensive copy.
        )(x_flat, *weights)
        return out_flat.reshape(B, C, H, W)

    # ---------------- HW-tiled two-pass fallback (reduce -> gate, then apply) --------
    # Tile width derived from the generation-aware budget (~4 resident tile buffers
    # + slack + f32 temp for sub-32-bit dtypes), rounded to 128 lanes.
    bytes_per_col = c_phys * itemsize * 6
    if itemsize < 4:
        bytes_per_col += c_phys * 4
    avail = max(fused_budget - 2 * weight_bytes - (4 << 20), 1 << 20)
    thw_fit = max((avail // bytes_per_col) // 128 * 128, 128)
    THW = min(thw_fit, _round_up(HW, 128))
    if hw_tile is not None:
        THW = min(THW, max(_round_up(hw_tile, 128), 128))
    HW_pad = _round_up(HW, THW)
    n_hw = HW_pad // THW
    needs_mask = HW_pad != HW

    if needs_mask:
        # Only the tiled fallback pads (zeros, to a tile multiple); the pad is a fresh
        # intermediate so the apply pass can safely write back into it in place.
        x_flat = jnp.pad(x_flat, ((0, 0), (0, 0), (0, HW_pad - HW)))

    tile_phys = c_phys * THW * itemsize
    vmem_need = 4 * tile_phys + 2 * weight_bytes + (2 << 20)
    if itemsize < 4:
        vmem_need += c_phys * THW * 4
    vmem_limit = int(min(max(vmem_need, 32 << 20), vmem_ceiling))

    # pass 1: per-batch running sum/max over HW tiles -> (B, C, 1) gate
    gate = pl.pallas_call(
        functools.partial(_reduce_kernel, C, HW, THW, needs_mask),
        out_shape=jax.ShapeDtypeStruct((B, C, 1), f32),
        grid_spec=pltpu.PrefetchScalarGridSpec(
            num_scalar_prefetch=0,
            grid=(B, n_hw),
            in_specs=[pl.BlockSpec((pl.Squeezed(), C, THW),
                                   lambda b, t: (b, 0, t))] + weight_specs,
            out_specs=pl.BlockSpec((pl.Squeezed(), C, 1), lambda b, t: (b, 0, 0)),
            scratch_shapes=[pltpu.VMEM((C, 1), f32),      # running sum
                            pltpu.VMEM((C, 1), f32),      # running max
                            pltpu.VMEM((C_pad, 2), f32)], # padded squeeze for the MLP
        ),
        compiler_params=pltpu.CompilerParams(
            dimension_semantics=("parallel", "arbitrary"),
            vmem_limit_bytes=vmem_limit),
    )(x_flat, *weights)

    # pass 2: elementwise apply of the gate, fully parallel over (B, HW tiles)
    out_flat = pl.pallas_call(
        _apply_kernel,
        out_shape=jax.ShapeDtypeStruct((B, C, HW_pad), dt),
        grid_spec=pltpu.PrefetchScalarGridSpec(
            num_scalar_prefetch=0,
            grid=(B, n_hw),
            in_specs=[pl.BlockSpec((pl.Squeezed(), C, THW), lambda b, t: (b, 0, t)),
                      pl.BlockSpec((pl.Squeezed(), C, 1), lambda b, t: (b, 0, 0))],
            out_specs=pl.BlockSpec((pl.Squeezed(), C, THW), lambda b, t: (b, 0, t)),
        ),
        compiler_params=pltpu.CompilerParams(
            dimension_semantics=("parallel", "parallel"),
            vmem_limit_bytes=vmem_limit),
        # alias only when x_flat is a fresh padded intermediate (never the caller's x)
        input_output_aliases=({0: 0} if needs_mask else {}),
    )(x_flat, gate)

    if needs_mask:
        out_flat = out_flat[:, :, :HW]
    return out_flat.reshape(B, C, H, W)


def _reference(x, w1, b1, w2, b2):
    """Pure-JAX reference matching the PyTorch forward (f32 math)."""
    B, C, H, W = x.shape
    flat = x.astype(jnp.float32).reshape(B, C, H * W)
    s_mean = flat.mean(axis=2)                                 # (B, C)
    s_max = flat.max(axis=2)                                   # (B, C)

    def mlp(s):
        h = jnp.maximum(s @ w1.T + b1, 0.0)                    # (B, Cr)
        return h @ w2.T + b2                                   # (B, C)

    gate = jax.nn.sigmoid(mlp(s_mean) + mlp(s_max))            # (B, C)
    return x.astype(jnp.float32) * gate[:, :, None, None]


if __name__ == "__main__":
    key = jax.random.PRNGKey(0)
    B, C, H, W = 2, 4, 16, 16
    Cr = C // 2

    kx, kw1, kb1, kw2, kb2, kx2 = jax.random.split(key, 6)
    x = jax.random.normal(kx, (B, C, H, W), dtype=jnp.float32)

    bound1 = 1.0 / (C ** 0.5)
    w1 = jax.random.uniform(kw1, (Cr, C), jnp.float32, -bound1, bound1)
    b1 = jax.random.uniform(kb1, (Cr,), jnp.float32, -bound1, bound1)
    bound2 = 1.0 / (Cr ** 0.5)
    w2 = jax.random.uniform(kw2, (C, Cr), jnp.float32, -bound2, bound2)
    b2 = jax.random.uniform(kb2, (C,), jnp.float32, -bound2, bound2)

    ref = _reference(x, w1, b1, w2, b2)
    # Mean/max are exact f32 now; only the tiny MLP matmuls run on the MXU.
    TOL = dict(atol=1e-3, rtol=1e-3)

    fused_fn = jax.jit(channel_mean_max_soft_attention)
    out = jax.block_until_ready(fused_fn(x, w1, b1, w2, b2))
    assert out.shape == (B, C, H, W) and out.dtype == x.dtype
    assert jnp.allclose(out, ref, **TOL), "fused f32 mismatch vs reference"

    # HW-tiled two-pass fallback (chosen automatically when the slab exceeds the
    # generation-aware VMEM budget); forced here to exercise it.
    tiled_fn = jax.jit(functools.partial(channel_mean_max_soft_attention,
                                         force_tiled=True, hw_tile=128))
    out_t = jax.block_until_ready(tiled_fn(x, w1, b1, w2, b2))
    assert jnp.allclose(out_t, ref, **TOL), "tiled f32 mismatch vs reference"

    # Non-128-multiple spatial size: fused path runs unpadded (full-block rule),
    # tiled path pads HW and masks only the last tile's max.
    x_odd = jax.random.normal(kx2, (B, C, 9, 14), dtype=jnp.float32)
    ref_odd = _reference(x_odd, w1, b1, w2, b2)
    out_odd = jax.block_until_ready(fused_fn(x_odd, w1, b1, w2, b2))
    assert jnp.allclose(out_odd, ref_odd, **TOL), "unaligned-HW fused mismatch"
    out_odd_t = jax.block_until_ready(tiled_fn(x_odd, w1, b1, w2, b2))
    assert jnp.allclose(out_odd_t, ref_odd, **TOL), "unaligned-HW tiled mismatch"

    # bf16 activations in / bf16 out (halves HBM traffic for this mem-bound kernel);
    # reductions / MLP / sigmoid stay in f32, the gate apply runs in bf16.
    x_bf = x.astype(jnp.bfloat16)
    out_bf = jax.block_until_ready(fused_fn(x_bf, w1, b1, w2, b2))
    assert out_bf.dtype == jnp.bfloat16
    ref_bf = _reference(x_bf.astype(jnp.float32), w1, b1, w2, b2)
    assert jnp.allclose(out_bf.astype(jnp.float32), ref_bf, atol=5e-2, rtol=5e-2), \
        "bf16 mismatch vs reference"

    print("KERNEL_OK")
</pallas_src>

<mosaic_0001>
module attributes {stable_mosaic.version = 11 : i64} {
  func.func @_fused_kernel(%arg0: i32, %arg1: memref<1x4x256xf32, #tpu.memory_space<vmem>>, %arg2: memref<8x8xf32, #tpu.memory_space<vmem>>, %arg3: memref<8x1xf32, #tpu.memory_space<vmem>>, %arg4: memref<8x8xf32, #tpu.memory_space<vmem>>, %arg5: memref<8x1xf32, #tpu.memory_space<vmem>>, %arg6: memref<1x4x256xf32, #tpu.memory_space<vmem>>, %arg7: memref<8x2xf32, #tpu.memory_space<vmem>>) attributes {dimension_semantics = [#tpu.dimension_semantics<parallel>], iteration_bounds = array<i64: 2>, scalar_prefetch = 0 : i64, scratch_operands = 1 : i64, tpu.core_type = #tpu.core_type<tc>, window_params = [{transform_indices = @transform_0, window_bounds = array<i64: 1, 4, 256>}, {pipeline_mode = #tpu.pipeline_mode<synchronous>, transform_indices = @transform_1, window_bounds = array<i64: 8, 8>}, {pipeline_mode = #tpu.pipeline_mode<synchronous>, transform_indices = @transform_2, window_bounds = array<i64: 8, 1>}, {pipeline_mode = #tpu.pipeline_mode<synchronous>, transform_indices = @transform_3, window_bounds = array<i64: 8, 8>}, {pipeline_mode = #tpu.pipeline_mode<synchronous>, transform_indices = @transform_4, window_bounds = array<i64: 8, 1>}, {transform_indices = @transform_5, window_bounds = array<i64: 1, 4, 256>}]} {
    %c0 = arith.constant 0 : index
    %c0_0 = arith.constant 0 : index
    %c0_1 = arith.constant 0 : index
    %0 = vector.load %arg1[%c0, %c0_0, %c0_1] : memref<1x4x256xf32, #tpu.memory_space<vmem>>, vector<1x4x256xf32>
    %1 = vector.shape_cast %0 : vector<1x4x256xf32> to vector<4x256xf32>
    %cst = arith.constant dense<0.000000e+00> : vector<4xf32>
    %2 = vector.multi_reduction <add>, %1, %cst [1] : vector<4x256xf32> to vector<4xf32>
    %3 = vector.shape_cast %2 : vector<4xf32> to vector<4x1xf32>
    %cst_2 = arith.constant 3.906250e-03 : f32
    %4 = vector.broadcast %cst_2 : f32 to vector<4x1xf32>
    %5 = arith.mulf %3, %4 : vector<4x1xf32>
    %cst_3 = arith.constant dense<0xFF800000> : vector<4xf32>
    %6 = vector.multi_reduction <maximumf>, %1, %cst_3 [1] : vector<4x256xf32> to vector<4xf32>
    %7 = vector.shape_cast %6 : vector<4xf32> to vector<4x1xf32>
    %8 = tpu.iota {dimensions = array<i32: 1>} : vector<4x2xi32>
    %c0_i32 = arith.constant 0 : i32
    %9 = vector.broadcast %c0_i32 : i32 to vector<4x2xi32>
    %10 = arith.cmpi eq, %8, %9 : vector<4x2xi32>
    %11 = vector.shape_cast %5 : vector<4x1xf32> to vector<4x1xf32>
    %12 = vector.broadcast %11 : vector<4x1xf32> to vector<4x2xf32>
    %13 = vector.shape_cast %7 : vector<4x1xf32> to vector<4x1xf32>
    %14 = vector.broadcast %13 : vector<4x1xf32> to vector<4x2xf32>
    %15 = arith.select %10, %12, %14 : vector<4x2xi1>, vector<4x2xf32>
    %cst_4 = arith.constant 0.000000e+00 : f32
    %16 = vector.broadcast %cst_4 : f32 to vector<8x2xf32>
    %c0_5 = arith.constant 0 : index
    %c0_6 = arith.constant 0 : index
    %17 = vector.load %arg7[%c0_5, %c0_6] : memref<8x2xf32, #tpu.memory_space<vmem>>, vector<8x2xf32>
    tpu.vector_store %arg7[%c0_5, %c0_6], %16 {strides = array<i32>} : memref<8x2xf32, #tpu.memory_space<vmem>>, vector<8x2xf32>,
    %c0_7 = arith.constant 0 : index
    %c0_8 = arith.constant 0 : index
    %18 = vector.load %arg7[%c0_7, %c0_8] : memref<8x2xf32, #tpu.memory_space<vmem>>, vector<4x2xf32>
    tpu.vector_store %arg7[%c0_7, %c0_8], %15 {strides = array<i32>} : memref<8x2xf32, #tpu.memory_space<vmem>>, vector<4x2xf32>,
    %c0_9 = arith.constant 0 : index
    %c0_10 = arith.constant 0 : index
    %19 = vector.load %arg7[%c0_9, %c0_10] : memref<8x2xf32, #tpu.memory_space<vmem>>, vector<8x2xf32>
    %c0_11 = arith.constant 0 : index
    %c0_12 = arith.constant 0 : index
    %20 = vector.load %arg2[%c0_11, %c0_12] : memref<8x8xf32, #tpu.memory_space<vmem>>, vector<8x8xf32>
    %cst_13 = arith.constant dense<0.000000e+00> : vector<8x2xf32>
    %21 = tpu.matmul %20, %19, %cst_13 {dimension_numbers = #tpu.dot_dimension_numbers<[1], [0], [0], [1], [0, 0, 1, 1], [], []>} : vector<8x8xf32>, vector<8x2xf32>, vector<8x2xf32> -> vector<8x2xf32>
    %c0_14 = arith.constant 0 : index
    %c0_15 = arith.constant 0 : index
    %22 = vector.load %arg3[%c0_14, %c0_15] : memref<8x1xf32, #tpu.memory_space<vmem>>, vector<8x1xf32>
    %23 = vector.broadcast %22 : vector<8x1xf32> to vector<8x2xf32>
    %24 = arith.addf %21, %23 : vector<8x2xf32>
    %cst_16 = arith.constant 0.000000e+00 : f32
    %25 = vector.broadcast %cst_16 : f32 to vector<8x2xf32>
    %26 = arith.maximumf %24, %25 : vector<8x2xf32>
    %c0_17 = arith.constant 0 : index
    %c0_18 = arith.constant 0 : index
    %27 = vector.load %arg4[%c0_17, %c0_18] : memref<8x8xf32, #tpu.memory_space<vmem>>, vector<8x8xf32>
    %cst_19 = arith.constant dense<0.000000e+00> : vector<8x2xf32>
    %28 = tpu.matmul %27, %26, %cst_19 {dimension_numbers = #tpu.dot_dimension_numbers<[1], [0], [0], [1], [0, 0, 1, 1], [], []>} : vector<8x8xf32>, vector<8x2xf32>, vector<8x2xf32> -> vector<8x2xf32>
    %c0_20 = arith.constant 0 : index
    %c0_21 = arith.constant 0 : index
    %29 = vector.load %arg5[%c0_20, %c0_21] : memref<8x1xf32, #tpu.memory_space<vmem>>, vector<8x1xf32>
    %30 = vector.broadcast %29 : vector<8x1xf32> to vector<8x2xf32>
    %31 = arith.addf %28, %30 : vector<8x2xf32>
    %cst_22 = arith.constant dense<0.000000e+00> : vector<8xf32>
    %32 = vector.multi_reduction <add>, %31, %cst_22 [1] : vector<8x2xf32> to vector<8xf32>
    %33 = vector.shape_cast %32 : vector<8xf32> to vector<8x1xf32>
    %34 = arith.negf %33 : vector<8x1xf32>
    %35 = math.exp %34 : vector<8x1xf32>
    %cst_23 = arith.constant 1.000000e+00 : f32
    %36 = vector.broadcast %cst_23 : f32 to vector<8x1xf32>
    %37 = arith.addf %36, %35 : vector<8x1xf32>
    %38 = arith.divf %36, %37 : vector<8x1xf32>
    %39 = vector.extract_strided_slice %38 {offsets = [0, 0], sizes = [4, 1], strides = [1, 1]} : vector<8x1xf32> to vector<4x1xf32>
    %40 = vector.broadcast %39 : vector<4x1xf32> to vector<4x256xf32>
    %41 = arith.mulf %1, %40 : vector<4x256xf32>
    %c0_24 = arith.constant 0 : index
    %c0_25 = arith.constant 0 : index
    %c0_26 = arith.constant 0 : index
    %42 = vector.load %arg6[%c0_24, %c0_25, %c0_26] : memref<1x4x256xf32, #tpu.memory_space<vmem>>, vector<1x4x256xf32>
    %43 = vector.shape_cast %42 : vector<1x4x256xf32> to vector<4x256xf32>
    %44 = vector.shape_cast %41 : vector<4x256xf32> to vector<1x4x256xf32>
    tpu.vector_store %arg6[%c0_24, %c0_25, %c0_26], %44 {strides = array<i32>} : memref<1x4x256xf32, #tpu.memory_space<vmem>>, vector<1x4x256xf32>,
    return
  }
  func.func @transform_0(%arg0: i32) -> (i32, i32, i32) {
    %c0_i32 = arith.constant 0 : i32
    %c0_i32_0 = arith.constant 0 : i32
    %c0_i32_1 = arith.constant 0 : i32
    return %arg0, %c0_i32, %c0_i32_0 : i32, i32, i32
  }
  func.func @transform_1(%arg0: i32) -> (i32, i32) {
    %c0_i32 = arith.constant 0 : i32
    %c0_i32_0 = arith.constant 0 : i32
    %c0_i32_1 = arith.constant 0 : i32
    return %c0_i32, %c0_i32_0 : i32, i32
  }
  func.func @transform_2(%arg0: i32) -> (i32, i32) {
    %c0_i32 = arith.constant 0 : i32
    %c0_i32_0 = arith.constant 0 : i32
    %c0_i32_1 = arith.constant 0 : i32
    return %c0_i32, %c0_i32_0 : i32, i32
  }
  func.func @transform_3(%arg0: i32) -> (i32, i32) {
    %c0_i32 = arith.constant 0 : i32
    %c0_i32_0 = arith.constant 0 : i32
    %c0_i32_1 = arith.constant 0 : i32
    return %c0_i32, %c0_i32_0 : i32, i32
  }
  func.func @transform_4(%arg0: i32) -> (i32, i32) {
    %c0_i32 = arith.constant 0 : i32
    %c0_i32_0 = arith.constant 0 : i32
    %c0_i32_1 = arith.constant 0 : i32
    return %c0_i32, %c0_i32_0 : i32, i32
  }
  func.func @transform_5(%arg0: i32) -> (i32, i32, i32) {
    %c0_i32 = arith.constant 0 : i32
    %c0_i32_0 = arith.constant 0 : i32
    %c0_i32_1 = arith.constant 0 : i32
    return %arg0, %c0_i32, %c0_i32_0 : i32, i32, i32
  }
}

</mosaic_0001>

<bundles_post_ra>
// kernel: channel_mean_max_soft_attention.1
= control target key start
LH: loop header
LB: loop body
LE: loop exit
PB: predicated region body
PF: predicated region fallthrough
CT: control target
= control target key end

     0   :  { %s578_s18 = smov 0   ;;  %s623_s0 = inlined_call_operand.vmem [shape: f32[2,4,256], index: 0, kind: input, shape index: {}]   ;;  %s624_s1 = inlined_call_operand.vmem [shape: f32[8,8], index: 1, kind: input, shape index: {}]   ;;  %s625_s2 = inlined_call_operand.vmem [shape: f32[8,1], index: 2, kind: input, shape index: {}]   ;;  %s626_s3 = inlined_call_operand.vmem [shape: f32[8,8], index: 3, kind: input, shape index: {}]   ;;  %s627_s4 = inlined_call_operand.vmem [shape: f32[8,1], index: 4, kind: input, shape index: {}]   ;;  %s628_s5 = inlined_call_operand.vmem [shape: f32[2,4,256], index: 5, kind: output, shape index: {}]  }
   0x1 LB: > { %s487_s19 = sadd.s32 4294967295, %s542_s18   ;;  %p491_p0 = scmp.ge.s32.totalorder %s542_s18, 1  ;;  %s542_s18 = sphi %s578_s18, %s15_s18  }
   0x2   : > { %p187_p1 = scmp.lt.s32.totalorder %s542_s18, 3 }
   0x4   : > { %p188_p2 = pnand %p491_p0, %p187_p1 }
   0x5   : > { %p215_p3 = scmp.lt.s32.totalorder (!%p188_p2), %s487_s19, 1  ;;  %vm229_vm0 = vcmask (!%p188_p2), 1043456   ;;  %vm245_vm1 = vcmask (!%p188_p2), 15360   ;;  %v544_v8 = vmov (!%p188_p2), 0.0   ;;  %vm545_vm2 = vmmov (!%p188_p2), 0   ;;  %v251_v9 = vld [vmem:[%s625_s2] sm:$0xff] (!%p188_p2) }
   0x6   : > { %191 = sbr.rel (%p188_p2) target bundleno = 783 (0x30f), region = 40  ;;  %246 = vst.msk [vmem:[#allocation2] sm:$0xff] (!%p188_p2), %vm245_vm1, %v544_v8  ;;  %507 = vmatprep.subr.mxu0 (!%p188_p2), %v544_v8  ;;  %512 = vmatprep.subr.mxu1 (!%p188_p2), %v544_v8  ;;  %v546_v10 = vmov (!%p188_p2), 0   ;;  %v333_v11 = vld [vmem:[%s627_s4] sm:$0xff] (!%p188_p2)  ;;  %v241_v12 = vlaneseq (!%p188_p2)  ;;  %vm247_vm4 = vcmask (!%p188_p2), 11264   ;;  %vm257_vm5 = vcmask (!%p188_p2), 64512  }
   0x7   : > { %509 = vmatprep.mubr.msk.f32.mxu0 (!%p188_p2), %vm545_vm2, %v544_v8  ;;  %514 = vmatprep.mubr.msk.f32.mxu1 (!%p188_p2), %vm545_vm2, %v544_v8  ;;  %v250_v18 = vld [vmem:[%s624_s1] sm:$0xff] (!%p188_p2)  ;;  %v547_v35 = vmov (!%p188_p2), 839922192  }
   0x8   : > { %529 = vset.pattern.permute.xlu1 (!%p188_p2), %v546_v10  ;;  %530 = vset.pattern.permute.xlu0 (!%p188_p2), %v546_v10  ;;  %v242_v13 = vand.u32 (!%p188_p2), 127, %v241_v12  ;;  %v332_v25 = vld [vmem:[%s626_s3] sm:$0xff] (!%p188_p2)  ;;  %v423_v36 = vunpack.c.l.s4 (!%p188_p2), %v547_v35  ;;  %v426_v38 = vshrl.u32 (!%p188_p2), %v241_v12, 7 }
   0x9   : > { %254 = vperm.xlu1 (!%p188_p2), %529, %v251_v9  }
   0xa   : > { %vm243_vm3 = vcmp.eq.s32.totalorder (!%p188_p2), %v242_v13, 0  ;;  %v424_v37 = vunpack.c.0.s8 (!%p188_p2), %v423_v36 }
   0xc   : > { %v427_v39 = vsub.s32 (!%p188_p2), %v424_v37, %v426_v38 }
   0xd   : > { %s630_s19 = smov (!%p215_p3, %s487_s19), 1  ;;  %336 = vperm.xlu1 %529, %v333_v11  }
   0xe   : > { %s501_s20 = sshll.u32 %s630_s19, 3 }
   0xf   : > { %s219_s23 = scalar_lea.vmem %s623_s0, %s501_s20  ;;  %s224_s9 = scalar_lea.vmem %s628_s5, %s501_s20 }
  0x10   : > { %v594_v0 = vld [vmem:[%s219_s23] sm:$0xff] }
  0x11   : > { %v227_v1 = vcombine.high %v594_v0, %v594_v0  ;;  %v230_v2 = vsel %vm229_vm0, %v594_v0, 0.0  ;;  %v236_v4 = vsel %vm229_vm0, %v594_v0, -inf }
  0x13   : > { %v231_v3 = vsel %vm229_vm0, %v227_v1, 0.0  ;;  %v237_v5 = vsel %vm229_vm0, %v227_v1, -inf }
  0x14   : > { %v232_v6 = vadd.f32 %v231_v3, %v230_v2  ;;  %v238_v7 = vmax.f32 %v236_v4, %v237_v5 }
  0x16   : > { %233 = vadd.xlane.f32.xlu0 %v232_v6 }
  0x1a   : > { %239 = vmax.xlane.f32.xlu0 %v238_v7 }
  0x88   : > { %v255_v20 = vpop.permute.xlu1 %254 }
  0x8c   : > { %v337_v26 = vpop.permute.xlu1 %336 }
  0xa3   : > { %v234_v14 = vpop.xlane.xlu0 %233 }
  0xa4   : > { %v235_v15 = vmul.f32 0.00390625, %v234_v14 }
  0xa7   : > { %v240_v16 = vpop.xlane.xlu0 %239 }
  0xa8   : > { %v244_v17 = vsel %vm243_vm3, %v235_v15, %v240_v16 }
  0xa9   : > { %248 = vst.msk [vmem:[#allocation2] sm:$0xf] %vm247_vm4, %v244_v17 }
  0xb0   : > { %v249_v19 = vld [vmem:[#allocation2] sm:$0xff] }
  0xb1   : > { %508 = vmatpush3.msra.mxu0 %v249_v19 }
  0xb2   : > { %510 = vmatmul.mubr.msk.f32.vlgmr.msra.gmra.mrb[0].mxu0 %vm257_vm5, %v250_v18 }
 0x185   : > { %v327_v21 = vpop.f32.mrb[0].mxu0 }
 0x186   : > { %v328_v22 = vadd.f32 %v327_v21, %v255_v20  ;;  %v511_v23 = vpop.f32.mrb[1].mxu0 }
 0x188   : > { %v331_v24 = vmax.f32 %v328_v22, 0.0 }
 0x18a   : > { %513 = vmatpush3.msra.mxu1 %v331_v24 }
 0x18b   : > { %515 = vmatmul.mubr.msk.f32.vlgmr.msra.gmra.mrb[0].mxu1 %vm257_vm5, %v332_v25 }
 0x25e   : > { %v408_v27 = vpop.f32.mrb[0].mxu1 }
 0x25f   : > { %v409_v28 = vadd.f32 %v408_v27, %v337_v26  ;;  %v516_v29 = vpop.f32.mrb[1].mxu1 }
 0x261   : > { %v412_v30 = vsel %vm245_vm1, %v409_v28, 0.0 }
 0x262   : > { %413 = vadd.xlane.f32.xlu0 %v412_v30 }
 0x2ef   : > { %v414_v31 = vpop.xlane.xlu0 %413 }
 0x2f0   : > { %v498_v32 = vmul.f32 -1.442695, %v414_v31 }
 0x2f2   : > { %532 = vpow2.f32 %v498_v32 }
 0x2fc   : > { %v533_v33 = vpop.eup %532 }
 0x2fd   : > { %v418_v34 = vadd.f32 1.0, %v533_v33 }
 0x2ff   : > { %534 = vrcp.f32 %v418_v34 }
 0x309   : > { %v535_v40 = vpop.eup %534 }
 0x30a   : > { %v428_v41 = vrot.slane %v535_v40, %v427_v39 }
 0x30c   : > { %v430_v42 = vmul.f32 %v428_v41, %v594_v0 }
 0x30e   : > { %431 = vst [vmem:[%s224_s9] sm:$0xff] %v430_v42 }
 0x30f PF: > { %s15_s18 = sadd.s32 1, %s542_s18  }
 0x310   : > { %p12_p4 = scmp.ge.s32.totalorder %s15_s18, 4  }
 0x312   :  { %14 = sbr.rel (!%p12_p4) target bundleno = 1 (0x1), region = 70 }

</bundles_post_ra>
